<compile_context>
chip_gen: v5e
topology: v5e:2x2
jax: 0.10.0
libtpu: 0.0.40
codegen_flags: <defaults>
</compile_context>

<pallas_src>
import functools
import math

import jax
import jax.numpy as jnp
from jax import lax
from jax.experimental import pallas as pl
from jax.experimental.pallas import tpu as pltpu

LANE = 128      # vreg lane width  (last dim)
SUBLANE = 8     # vreg sublane width (second-to-last dim)


def _round_up(n, m):
    return ((n + m - 1) // m) * m


# ----------------------------------------------------------------------------
# Fused Pallas kernel: the entire MLP forward in one call
# ----------------------------------------------------------------------------
def _fused_mlp_kernel(t_ref, ce_ref, x_ref, w_ref, b_ref, o_ref, *,
                      mod_ch, n_main, res, max_period=10000.0):
    # t_ref : (Bp, 1)   raw timesteps
    # ce_ref: (Bp, Np)  condition embedding placed at lanes [mod_ch, mod_ch+cdim)
    # x_ref : (Bp, Np)  x placed at lanes [0, input_size)
    # w_ref : (2 + n_main, Kp, Np) packed weight stack
    # b_ref : (2 + n_main, 1, Np)  packed bias stack
    Bp, Np = x_ref.shape
    half = mod_ch // 2

    # ---- in-kernel sinusoidal timestep embedding (EUP/VPU, effectively free)
    lane = lax.broadcasted_iota(jnp.int32, (Bp, Np), 1)
    k = jnp.where(lane < half, lane, lane - half).astype(jnp.float32)
    freqs = jnp.exp((-math.log(max_period) / half) * k)
    args = t_ref[...] * freqs                       # (Bp,1) * (Bp,Np) broadcast
    te = jnp.where(lane < half, jnp.cos(args), jnp.sin(args))
    # assemble fused embedding-branch input: [cos | sin | (odd-pad 0) | cemb | 0]
    emb_in = jnp.where(lane < 2 * half, te, ce_ref[...])

    def lin(h, l, relu):
        acc = jnp.dot(h, w_ref[l], preferred_element_type=jnp.float32)
        acc = acc + b_ref[l]
        return jnp.maximum(acc, 0.0) if relu else acc

    # fused embedding branch: block-diag stage-1 (ReLU) + row-concat stage-2
    emb = lin(lin(emb_in, 0, True), 1, False)       # = t_emb + c_emb (zero-padded)

    # fused add3 epilogue
    h = x_ref[...] + emb

    # main stack: (Linear -> ReLU) * (n_main - 1) -> final Linear
    for i in range(n_main - 1):
        prev = h
        h = lin(h, 2 + i, True)
        if res:                                     # res=0 default (module parity)
            h = h + prev
    o_ref[...] = lin(h, 2 + n_main - 1, False).astype(o_ref.dtype)


# ----------------------------------------------------------------------------
# Parameter init (mimics PyTorch nn.Linear) and packing into stacked tensors
# ----------------------------------------------------------------------------
def _init_linear(key, fan_in, fan_out, dtype=jnp.float32):
    kw, kb = jax.random.split(key)
    bound = 1.0 / math.sqrt(fan_in)
    w = jax.random.uniform(kw, (fan_in, fan_out), dtype, -bound, bound)
    b = jax.random.uniform(kb, (fan_out,), dtype, -bound, bound)
    return w, b


def init_mlp_params(key, input_size, hidden_sizes, cond_sizes, t_sizes, mod_ch, cdim):
    keys = jax.random.split(key, len(hidden_sizes) + 1 + 2 + 2)
    k = iter(keys)
    params = {}
    layers = []
    dims = [input_size] + list(hidden_sizes) + [input_size]
    for i in range(len(dims) - 1):
        layers.append(_init_linear(next(k), dims[i], dims[i + 1]))
    params["layers"] = layers
    params["temb"] = [
        _init_linear(next(k), mod_ch, t_sizes),
        _init_linear(next(k), t_sizes, input_size),
    ]
    params["cemb"] = [
        _init_linear(next(k), cdim, cond_sizes),
        _init_linear(next(k), cond_sizes, input_size),
    ]
    return params


def pack_params_for_kernel(params):
    """Pack everything into one weight stack + one bias stack (2 entry DMAs).

    Layer 0 is the block-diagonal fused first embedding stage, layer 1 the
    row-concatenated fused second stage (bias = tb1 + cb1), layers 2.. are
    the main stack.  Zero padding is exact through ReLU and the matmul chain.
    """
    tw0, tb0 = params["temb"][0]
    tw1, tb1 = params["temb"][1]
    cw0, cb0 = params["cemb"][0]
    cw1, cb1 = params["cemb"][1]
    mod_ch, t_sizes = tw0.shape
    cdim, cond_sizes = cw0.shape
    input_size = tw1.shape[1]
    layers = params["layers"]

    Ns = [t_sizes + cond_sizes, input_size] + [w.shape[1] for w, _ in layers]
    Np = _round_up(max(Ns), LANE)
    Kp = Np  # activations are Np-wide throughout, so contraction dim == Np

    def place_w(blocks):
        w = jnp.zeros((Kp, Np), jnp.float32)
        for r, c, a in blocks:
            w = w.at[r:r + a.shape[0], c:c + a.shape[1]].set(a)
        return w

    def place_b(blocks):
        b = jnp.zeros((1, Np), jnp.float32)
        for c, a in blocks:
            b = b.at[0, c:c + a.shape[0]].set(a)
        return b

    w_list = [
        place_w([(0, 0, tw0), (mod_ch, t_sizes, cw0)]),     # block-diag stage 1
        place_w([(0, 0, tw1), (t_sizes, 0, cw1)]),          # row-concat stage 2
    ]
    b_list = [
        place_b([(0, tb0), (t_sizes, cb0)]),
        place_b([(0, tb1 + cb1)]),
    ]
    for w, b in layers:
        w_list.append(place_w([(0, 0, w)]))
        b_list.append(place_b([(0, b)]))

    meta = dict(mod_ch=int(mod_ch), cdim=int(cdim), t_sizes=int(t_sizes),
                cond_sizes=int(cond_sizes), input_size=int(input_size),
                n_main=len(layers), Np=int(Np))
    return jnp.stack(w_list), jnp.stack(b_list), meta


# ----------------------------------------------------------------------------
# Forward pass (matches PyTorch MLP.forward with res=0)
# ----------------------------------------------------------------------------
def make_forward(meta, res=0):
    mod_ch = meta["mod_ch"]
    cdim = meta["cdim"]
    input_size = meta["input_size"]
    n_main = meta["n_main"]
    Np = meta["Np"]

    kernel = functools.partial(_fused_mlp_kernel, mod_ch=mod_ch,
                               n_main=n_main, res=res)

    @jax.jit
    def fwd(w_stack, b_stack, x, t, cemb):
        B = x.shape[0]
        Bp = _round_up(max(B, SUBLANE), SUBLANE)
        x2 = x.reshape(B, input_size).astype(jnp.float32)

        # Tiny host-side zero-pads (fuse under jit); te is computed in-kernel.
        x_pad = jnp.zeros((Bp, Np), jnp.float32).at[:B, :input_size].set(x2)
        ce_pad = jnp.zeros((Bp, Np), jnp.float32).at[
            :B, mod_ch:mod_ch + cdim].set(cemb.astype(jnp.float32))
        t_pad = jnp.zeros((Bp, 1), jnp.float32).at[:B, 0].set(
            t.astype(jnp.float32))

        # Actual footprint ~0.4 MiB; budget 2x params + 4 MiB headroom.
        vmem_limit = int(2 * (w_stack.size + b_stack.size)
                         * jnp.dtype(w_stack.dtype).itemsize + (1 << 22))

        out = pl.pallas_call(
            kernel,
            out_shape=jax.ShapeDtypeStruct((Bp, Np), jnp.float32),
            # No grid / BlockSpecs: single full-block invocation, everything
            # VMEM-resident.  Safe on v5e/v6e (128 MiB) and v7x (64 MiB).
            compiler_params=pltpu.CompilerParams(vmem_limit_bytes=vmem_limit),
        )(t_pad, ce_pad, x_pad, w_stack, b_stack)
        return out[:B, :input_size]

    return fwd


# ----------------------------------------------------------------------------
# Pure-JAX reference for verification (raw, unfused params; mirrors PyTorch)
# ----------------------------------------------------------------------------
def timestep_embedding(timesteps, dim, max_period=10000.0):
    half = dim // 2
    freqs = jnp.exp(
        -math.log(max_period) * jnp.arange(half, dtype=jnp.float32) / half)
    args = timesteps[:, None].astype(jnp.float32) * freqs[None, :]
    emb = jnp.concatenate([jnp.cos(args), jnp.sin(args)], axis=-1)
    if dim % 2:
        emb = jnp.concatenate([emb, jnp.zeros_like(emb[:, :1])], axis=-1)
    return emb


def mlp_forward_ref(params, x, t, cemb, *, input_size, mod_ch, res=0):
    def lin(h, wb, relu):
        w, b = wb
        y = h @ w + b
        return jnp.maximum(y, 0.0) if relu else y

    te = timestep_embedding(t, mod_ch)
    t_emb = lin(lin(te, params["temb"][0], True), params["temb"][1], False)
    c_emb = lin(lin(cemb, params["cemb"][0], True), params["cemb"][1], False)
    h = x.reshape(x.shape[0], input_size) + t_emb + c_emb
    for wb in params["layers"][:-1]:
        prev = h
        h = lin(h, wb, True)
        if res:
            h = h + prev
    return lin(h, params["layers"][-1], False)


# ----------------------------------------------------------------------------
if __name__ == "__main__":
    # Small, module-consistent shapes.
    B = 8
    input_size = 32
    hidden_sizes = [128, 128, 128]
    cond_sizes = 64
    t_sizes = 64
    mod_ch = 64
    cdim = 10

    key = jax.random.PRNGKey(0)
    kp, kx, kt, kc = jax.random.split(key, 4)

    params = init_mlp_params(
        kp, input_size, hidden_sizes, cond_sizes, t_sizes, mod_ch, cdim)
    w_stack, b_stack, meta = pack_params_for_kernel(params)

    # x can be any shape that flattens to [B, input_size]
    x = jax.random.normal(kx, (B, 2, 16), dtype=jnp.float32)
    t = jax.random.uniform(kt, (B,), jnp.float32, 0.0, 1000.0)
    cemb = jax.random.normal(kc, (B, cdim), dtype=jnp.float32)

    fwd = make_forward(meta, res=0)
    out = jax.block_until_ready(fwd(w_stack, b_stack, x, t, cemb))
    ref = mlp_forward_ref(params, x, t, cemb, input_size=input_size,
                          mod_ch=mod_ch)

    assert out.shape == (B, input_size), out.shape
    # Tolerance covers f32 accumulation-order differences from the exact
    # algebraic embedding fusion and in-kernel vs. XLA sin/cos/exp ulps.
    assert jnp.allclose(out, ref, atol=2e-3, rtol=2e-3), "mismatch vs JAX reference"
    print("KERNEL_OK")
</pallas_src>

<mosaic_0001>
module attributes {stable_mosaic.version = 11 : i64} {
  func.func @_fused_mlp_kernel(%arg0: memref<8x1xf32, #tpu.memory_space<vmem>>, %arg1: memref<8x128xf32, #tpu.memory_space<vmem>>, %arg2: memref<8x128xf32, #tpu.memory_space<vmem>>, %arg3: memref<6x128x128xf32, #tpu.memory_space<vmem>>, %arg4: memref<6x1x128xf32, #tpu.memory_space<vmem>>, %arg5: memref<8x128xf32, #tpu.memory_space<vmem>>) attributes {dimension_semantics = [], scalar_prefetch = 0 : i64, scratch_operands = 0 : i64, tpu.core_type = #tpu.core_type<tc>} {
    %0 = tpu.iota {dimensions = array<i32: 1>} : vector<8x128xi32>
    %c32_i32 = arith.constant 32 : i32
    %1 = vector.broadcast %c32_i32 : i32 to vector<8x128xi32>
    %2 = arith.cmpi slt, %0, %1 : vector<8x128xi32>
    %c32_i32_0 = arith.constant 32 : i32
    %3 = vector.broadcast %c32_i32_0 : i32 to vector<8x128xi32>
    %4 = arith.subi %0, %3 : vector<8x128xi32>
    %5 = arith.select %2, %0, %4 : vector<8x128xi1>, vector<8x128xi32>
    %6 = arith.sitofp %5 : vector<8x128xi32> to vector<8x128xf32>
    %cst = arith.constant -0.287823141 : f32
    %7 = vector.broadcast %cst : f32 to vector<8x128xf32>
    %8 = arith.mulf %7, %6 : vector<8x128xf32>
    %9 = math.exp %8 : vector<8x128xf32>
    %c0 = arith.constant 0 : index
    %c0_1 = arith.constant 0 : index
    %10 = vector.load %arg0[%c0, %c0_1] : memref<8x1xf32, #tpu.memory_space<vmem>>, vector<8x1xf32>
    %11 = vector.broadcast %10 : vector<8x1xf32> to vector<8x128xf32>
    %12 = arith.mulf %11, %9 : vector<8x128xf32>
    %c32_i32_2 = arith.constant 32 : i32
    %13 = vector.broadcast %c32_i32_2 : i32 to vector<8x128xi32>
    %14 = arith.cmpi slt, %0, %13 : vector<8x128xi32>
    %15 = math.cos %12 : vector<8x128xf32>
    %16 = math.sin %12 : vector<8x128xf32>
    %17 = arith.select %14, %15, %16 : vector<8x128xi1>, vector<8x128xf32>
    %c64_i32 = arith.constant 64 : i32
    %18 = vector.broadcast %c64_i32 : i32 to vector<8x128xi32>
    %19 = arith.cmpi slt, %0, %18 : vector<8x128xi32>
    %c0_3 = arith.constant 0 : index
    %c0_4 = arith.constant 0 : index
    %20 = vector.load %arg1[%c0_3, %c0_4] : memref<8x128xf32, #tpu.memory_space<vmem>>, vector<8x128xf32>
    %21 = arith.select %19, %17, %20 : vector<8x128xi1>, vector<8x128xf32>
    %c0_5 = arith.constant 0 : index
    %c0_6 = arith.constant 0 : index
    %c0_7 = arith.constant 0 : index
    %22 = vector.load %arg3[%c0_5, %c0_6, %c0_7] : memref<6x128x128xf32, #tpu.memory_space<vmem>>, vector<1x128x128xf32>
    %23 = vector.shape_cast %22 : vector<1x128x128xf32> to vector<128x128xf32>
    %cst_8 = arith.constant dense<0.000000e+00> : vector<8x128xf32>
    %24 = tpu.matmul %21, %23, %cst_8 {dimension_numbers = #tpu.dot_dimension_numbers<[1], [0], [0], [1], [0, 0, 1, 1], [], []>} : vector<8x128xf32>, vector<128x128xf32>, vector<8x128xf32> -> vector<8x128xf32>
    %c0_9 = arith.constant 0 : index
    %c0_10 = arith.constant 0 : index
    %c0_11 = arith.constant 0 : index
    %25 = vector.load %arg4[%c0_9, %c0_10, %c0_11] : memref<6x1x128xf32, #tpu.memory_space<vmem>>, vector<1x1x128xf32>
    %26 = vector.shape_cast %25 : vector<1x1x128xf32> to vector<1x128xf32>
    %27 = vector.broadcast %26 : vector<1x128xf32> to vector<8x128xf32>
    %28 = arith.addf %24, %27 : vector<8x128xf32>
    %cst_12 = arith.constant 0.000000e+00 : f32
    %29 = vector.broadcast %cst_12 : f32 to vector<8x128xf32>
    %30 = arith.maximumf %28, %29 : vector<8x128xf32>
    %c1 = arith.constant 1 : index
    %c0_13 = arith.constant 0 : index
    %c0_14 = arith.constant 0 : index
    %31 = vector.load %arg3[%c1, %c0_13, %c0_14] : memref<6x128x128xf32, #tpu.memory_space<vmem>>, vector<1x128x128xf32>
    %32 = vector.shape_cast %31 : vector<1x128x128xf32> to vector<128x128xf32>
    %cst_15 = arith.constant dense<0.000000e+00> : vector<8x128xf32>
    %33 = tpu.matmul %30, %32, %cst_15 {dimension_numbers = #tpu.dot_dimension_numbers<[1], [0], [0], [1], [0, 0, 1, 1], [], []>} : vector<8x128xf32>, vector<128x128xf32>, vector<8x128xf32> -> vector<8x128xf32>
    %c1_16 = arith.constant 1 : index
    %c0_17 = arith.constant 0 : index
    %c0_18 = arith.constant 0 : index
    %34 = vector.load %arg4[%c1_16, %c0_17, %c0_18] : memref<6x1x128xf32, #tpu.memory_space<vmem>>, vector<1x1x128xf32>
    %35 = vector.shape_cast %34 : vector<1x1x128xf32> to vector<1x128xf32>
    %36 = vector.broadcast %35 : vector<1x128xf32> to vector<8x128xf32>
    %37 = arith.addf %33, %36 : vector<8x128xf32>
    %c0_19 = arith.constant 0 : index
    %c0_20 = arith.constant 0 : index
    %38 = vector.load %arg2[%c0_19, %c0_20] : memref<8x128xf32, #tpu.memory_space<vmem>>, vector<8x128xf32>
    %39 = arith.addf %38, %37 : vector<8x128xf32>
    %c2 = arith.constant 2 : index
    %c0_21 = arith.constant 0 : index
    %c0_22 = arith.constant 0 : index
    %40 = vector.load %arg3[%c2, %c0_21, %c0_22] : memref<6x128x128xf32, #tpu.memory_space<vmem>>, vector<1x128x128xf32>
    %41 = vector.shape_cast %40 : vector<1x128x128xf32> to vector<128x128xf32>
    %cst_23 = arith.constant dense<0.000000e+00> : vector<8x128xf32>
    %42 = tpu.matmul %39, %41, %cst_23 {dimension_numbers = #tpu.dot_dimension_numbers<[1], [0], [0], [1], [0, 0, 1, 1], [], []>} : vector<8x128xf32>, vector<128x128xf32>, vector<8x128xf32> -> vector<8x128xf32>
    %c2_24 = arith.constant 2 : index
    %c0_25 = arith.constant 0 : index
    %c0_26 = arith.constant 0 : index
    %43 = vector.load %arg4[%c2_24, %c0_25, %c0_26] : memref<6x1x128xf32, #tpu.memory_space<vmem>>, vector<1x1x128xf32>
    %44 = vector.shape_cast %43 : vector<1x1x128xf32> to vector<1x128xf32>
    %45 = vector.broadcast %44 : vector<1x128xf32> to vector<8x128xf32>
    %46 = arith.addf %42, %45 : vector<8x128xf32>
    %cst_27 = arith.constant 0.000000e+00 : f32
    %47 = vector.broadcast %cst_27 : f32 to vector<8x128xf32>
    %48 = arith.maximumf %46, %47 : vector<8x128xf32>
    %c3 = arith.constant 3 : index
    %c0_28 = arith.constant 0 : index
    %c0_29 = arith.constant 0 : index
    %49 = vector.load %arg3[%c3, %c0_28, %c0_29] : memref<6x128x128xf32, #tpu.memory_space<vmem>>, vector<1x128x128xf32>
    %50 = vector.shape_cast %49 : vector<1x128x128xf32> to vector<128x128xf32>
    %cst_30 = arith.constant dense<0.000000e+00> : vector<8x128xf32>
    %51 = tpu.matmul %48, %50, %cst_30 {dimension_numbers = #tpu.dot_dimension_numbers<[1], [0], [0], [1], [0, 0, 1, 1], [], []>} : vector<8x128xf32>, vector<128x128xf32>, vector<8x128xf32> -> vector<8x128xf32>
    %c3_31 = arith.constant 3 : index
    %c0_32 = arith.constant 0 : index
    %c0_33 = arith.constant 0 : index
    %52 = vector.load %arg4[%c3_31, %c0_32, %c0_33] : memref<6x1x128xf32, #tpu.memory_space<vmem>>, vector<1x1x128xf32>
    %53 = vector.shape_cast %52 : vector<1x1x128xf32> to vector<1x128xf32>
    %54 = vector.broadcast %53 : vector<1x128xf32> to vector<8x128xf32>
    %55 = arith.addf %51, %54 : vector<8x128xf32>
    %cst_34 = arith.constant 0.000000e+00 : f32
    %56 = vector.broadcast %cst_34 : f32 to vector<8x128xf32>
    %57 = arith.maximumf %55, %56 : vector<8x128xf32>
    %c4 = arith.constant 4 : index
    %c0_35 = arith.constant 0 : index
    %c0_36 = arith.constant 0 : index
    %58 = vector.load %arg3[%c4, %c0_35, %c0_36] : memref<6x128x128xf32, #tpu.memory_space<vmem>>, vector<1x128x128xf32>
    %59 = vector.shape_cast %58 : vector<1x128x128xf32> to vector<128x128xf32>
    %cst_37 = arith.constant dense<0.000000e+00> : vector<8x128xf32>
    %60 = tpu.matmul %57, %59, %cst_37 {dimension_numbers = #tpu.dot_dimension_numbers<[1], [0], [0], [1], [0, 0, 1, 1], [], []>} : vector<8x128xf32>, vector<128x128xf32>, vector<8x128xf32> -> vector<8x128xf32>
    %c4_38 = arith.constant 4 : index
    %c0_39 = arith.constant 0 : index
    %c0_40 = arith.constant 0 : index
    %61 = vector.load %arg4[%c4_38, %c0_39, %c0_40] : memref<6x1x128xf32, #tpu.memory_space<vmem>>, vector<1x1x128xf32>
    %62 = vector.shape_cast %61 : vector<1x1x128xf32> to vector<1x128xf32>
    %63 = vector.broadcast %62 : vector<1x128xf32> to vector<8x128xf32>
    %64 = arith.addf %60, %63 : vector<8x128xf32>
    %cst_41 = arith.constant 0.000000e+00 : f32
    %65 = vector.broadcast %cst_41 : f32 to vector<8x128xf32>
    %66 = arith.maximumf %64, %65 : vector<8x128xf32>
    %c5 = arith.constant 5 : index
    %c0_42 = arith.constant 0 : index
    %c0_43 = arith.constant 0 : index
    %67 = vector.load %arg3[%c5, %c0_42, %c0_43] : memref<6x128x128xf32, #tpu.memory_space<vmem>>, vector<1x128x128xf32>
    %68 = vector.shape_cast %67 : vector<1x128x128xf32> to vector<128x128xf32>
    %cst_44 = arith.constant dense<0.000000e+00> : vector<8x128xf32>
    %69 = tpu.matmul %66, %68, %cst_44 {dimension_numbers = #tpu.dot_dimension_numbers<[1], [0], [0], [1], [0, 0, 1, 1], [], []>} : vector<8x128xf32>, vector<128x128xf32>, vector<8x128xf32> -> vector<8x128xf32>
    %c5_45 = arith.constant 5 : index
    %c0_46 = arith.constant 0 : index
    %c0_47 = arith.constant 0 : index
    %70 = vector.load %arg4[%c5_45, %c0_46, %c0_47] : memref<6x1x128xf32, #tpu.memory_space<vmem>>, vector<1x1x128xf32>
    %71 = vector.shape_cast %70 : vector<1x1x128xf32> to vector<1x128xf32>
    %72 = vector.broadcast %71 : vector<1x128xf32> to vector<8x128xf32>
    %73 = arith.addf %69, %72 : vector<8x128xf32>
    %c0_48 = arith.constant 0 : index
    %c0_49 = arith.constant 0 : index
    %74 = vector.load %arg5[%c0_48, %c0_49] : memref<8x128xf32, #tpu.memory_space<vmem>>, vector<8x128xf32>
    tpu.vector_store %arg5[%c0_48, %c0_49], %73 {strides = array<i32>} : memref<8x128xf32, #tpu.memory_space<vmem>>, vector<8x128xf32>,
    return
  }
}

</mosaic_0001>

<bundles_post_ra>
// kernel: fwd.1
= control target key start
LH: loop header
LB: loop body
LE: loop exit
PB: predicated region body
PF: predicated region fallthrough
CT: control target
= control target key end

     0   :  { %10 = vsyncpa [#allocation3], 0  ;;  %s882_s0 = inlined_call_operand.vmem [shape: f32[8,1], index: 0, kind: input, shape index: {}]   ;;  %s883_s1 = inlined_call_operand.vmem [shape: f32[8,128], index: 1, kind: input, shape index: {}]   ;;  %s884_s2 = inlined_call_operand.vmem [shape: f32[8,128], index: 2, kind: input, shape index: {}]   ;;  %s885_s3 = inlined_call_operand.hbm [shape: f32[6,128,128], index: 3, kind: input, shape index: {}]   ;;  %s886_s4 = inlined_call_operand.vmem [shape: f32[6,1,128], index: 4, kind: input, shape index: {}]   ;;  %s887_s5 = inlined_call_operand.hbm [shape: f32[8,128], index: 5, kind: output, shape index: {}]  }
   0x1   :  { %11 = vsyncpa [#allocation4], 0  ;;  %s22_s20 = sshll.u32 %s885_s3, 4  ;;  %s724_s21 = smov [#allocation2]   ;;  %s23_s20 = int_to_ptr.hbm [resolvable:$true] %s22_s20 }
   0x2   :  { %s24_s22 = sshll.u32 %s724_s21, 4  ;;  %s725_s23 = smov 128   ;;  %s25_s22 = int_to_ptr.vmem [resolvable:$true] %s24_s22 }
   0x3   :  { %s726_s24 = smov 8  }
   0x4   :  { %30 = dma.hbm_to_vmem [thread:$0]  %s23_s20, 12288, %s25_s22, [#allocation3], %s725_s23, %s725_s23, %s726_s24  }
   0x5   :  { %720 = dma.done.wait [#allocation3], 12288  }
   0x6   :  { %721 = vsyncadd [#allocation3], 4294955008  ;;  %v727_v0 = vmov 0   ;;  %v46_v1 = vld [vmem:[%s882_s0] sm:$0xff]  ;;  %v37_v2 = vlaneseq  ;;  %v728_v23 = vmov 683565275  }
   0x7   :  { %663 = vset.pattern.permute.xlu0 %v727_v0  ;;  %v729_v25 = vmov 2475754826   ;;  %v730_v28 = vmov 2131351028   ;;  %v731_v31 = vmov 2102212464  }
   0x8   :  { %49 = vperm.xlu0 %663, %v46_v1   ;;  %v772_v3 = vand.u32 127, %v37_v2  ;;  %v732_v34 = vmov 920167782   ;;  %v733_v37 = vmov 1326507024   ;;  %s734_s14 = smov [#allocation5]  }
   0x9   :  { %s628_s15 = sshll.u32 %s734_s14, 4  ;;  %s630_s18 = sshll.u32 %s887_s5, 4  ;;  %s629_s15 = int_to_ptr.vmem [resolvable:$true] %s628_s15  ;;  %s631_s18 = int_to_ptr.hbm [resolvable:$true] %s630_s18 }
   0xa   :  { %v640_v4 = vadd.s32 4294967264, %v772_v3  ;;  %vm39_vm0 = vcmp.lt.s32.totalorder %v772_v3, 32 }
   0xc   :  { %v41_v5 = vsel %vm39_vm0, %v772_v3, %v640_v4 }
   0xd   :  { %v42_v6 = vcvt.s32.f32 %v41_v5 }
   0xf   :  { %v43_v7 = vmul.f32 -0.28782314, %v42_v6 }
  0x11   :  { %v44_v8 = vmul.f32 1.442695, %v43_v7 }
  0x13   :  { %670 = vpow2.f32 %v44_v8 }
  0x19   :  { %v671_v9 = vpop.eup %670 }
  0x7a   :  { %v50_v10 = vpop.permute.xlu0 %49 }
  0x7b   :  { %v779_v11 = vmul.f32 %v671_v9, %v50_v10 }
  0x7d   :  { %v56_v12 = vand.u32 2139095040, %v779_v11  ;;  %v53_v15 = vand.u32 2147483647, %v779_v11  ;;  %vm55_vm13 = vcmp.lt.s32.totalorder %v779_v11, 0 }
  0x7f   :  { %v57_v13 = vshrl.u32 %v56_v12, 23  ;;  %v60_v17 = vand.u32 8388607, %v53_v15  ;;  %vm840_vm14 = vcmp.le.f32.partialorder %v53_v15, 0.7853982 }
  0x81   :  { %v641_v14 = vadd.s32 4294967169, %v57_v13  ;;  %v61_v21 = vor.u32 8388608, %v60_v17 }
  0x83   :  { %v63_v16 = vadd.s32 1, %v641_v14  ;;  %v796_v44 = vshll.u32 %v61_v21, 8 }
  0x85   :  { %vm64_vm1 = vcmp.gt.s32.totalorder %v63_v16, 0  ;;  %v102_v53 = vand.u32 65535, %v796_v44  ;;  %v103_v54 = vshrl.u32 %v796_v44, 16 }
  0x86   :  { %v65_v18 = vsel %vm64_vm1, %v63_v16, 0 }
  0x87   :  { %v67_v19 = vand.u32 31, %v65_v18  ;;  %v787_v22 = vshrl.u32 %v65_v18, 5 }
  0x89   :  { %v785_v20 = vsub.s32 32, %v67_v19  ;;  %v70_v24 = vshll.u32 %v728_v23, %v67_v19  ;;  %v73_v26 = vshll.u32 %v729_v25, %v67_v19  ;;  %v76_v30 = vshll.u32 %v730_v28, %v67_v19 }
  0x8a   :  { %v79_v33 = vshll.u32 %v731_v31, %v67_v19  ;;  %v82_v36 = vshll.u32 %v732_v34, %v67_v19  ;;  %vm85_vm2 = vcmp.lt.s32.totalorder %v787_v22, 1  ;;  %vm88_vm3 = vcmp.lt.s32.totalorder %v787_v22, 4 }
  0x8b   :  { %v71_v27 = vshrl.u32 %v729_v25, %v785_v20  ;;  %v74_v29 = vshrl.u32 %v730_v28, %v785_v20  ;;  %v77_v32 = vshrl.u32 %v731_v31, %v785_v20  ;;  %v80_v35 = vshrl.u32 %v732_v34, %v785_v20 }
  0x8c   :  { %v83_v38 = vshrl.u32 %v733_v37, %v785_v20  ;;  %vm87_vm4 = vcmp.lt.s32.totalorder %v787_v22, 3  ;;  %vm86_vm5 = vcmp.lt.s32.totalorder %v787_v22, 2  ;;  %v69_v19 = vshrl.u32 %v728_v23, %v785_v20  ;;  %v380_v37 = vld [vmem:[#allocation2 + $0x70] sm:$0xff] }
  0x8d   :  { %v72_v39 = vor.u32 %v71_v27, %v70_v24  ;;  %v75_v40 = vor.u32 %v74_v29, %v73_v26  ;;  %v78_v41 = vor.u32 %v77_v32, %v76_v30  ;;  %v81_v42 = vor.u32 %v80_v35, %v79_v33 }
  0x8e   :  { %v84_v43 = vor.u32 %v83_v38, %v82_v36  ;;  %v381_v36 = vld [vmem:[#allocation2 + $0x78] sm:$0xff] }
  0x8f   :  { %v93_v45 = vsel %vm85_vm2, %v72_v39, %v75_v40  ;;  %v97_v46 = vsel %vm85_vm2, %v75_v40, %v78_v41  ;;  %v94_v47 = vsel %vm88_vm3, %v81_v42, 920167782  ;;  %v90_v16 = vsel %vm88_vm3, %v78_v41, 2102212464  ;;  %386 = vmatpush.msra.mxu0 %v381_v36 }
  0x90   :  { %v98_v48 = vsel %vm88_vm3, %v84_v43, 1326507024  ;;  %v95_v49 = vsel %vm87_vm4, %v78_v41, %v94_v47  ;;  %v89_v28 = vsel %vm85_vm2, %v69_v19, %v72_v39  ;;  %v91_v29 = vsel %vm87_vm4, %v75_v40, %v90_v16  ;;  %v379_v40 = vld [vmem:[#allocation2 + $0x68] sm:$0xff] }
  0x91   :  { %v99_v50 = vsel %vm87_vm4, %v81_v42, %v98_v48  ;;  %v96_v51 = vsel %vm86_vm5, %v93_v45, %v95_v49  ;;  %v92_v20 = vsel %vm86_vm5, %v89_v28, %v91_v29  ;;  %387 = vmatpush.msra.mxu0 %v380_v37  ;;  %v378_v42 = vld [vmem:[#allocation2 + $0x60] sm:$0xff]  ;;  %v377_v45 = vld [vmem:[#allocation2 + $0x58] sm:$0xff]  ;;  %v375_v47 = vld [vmem:[#allocation2 + $0x48] sm:$0xff] }
  0x92   :  { %v100_v52 = vsel %vm86_vm5, %v97_v46, %v99_v50  ;;  %v126_v57 = vand.u32 65535, %v96_v51  ;;  %v127_v58 = vshrl.u32 %v96_v51, 16  ;;  %v146_v38 = vmul.u32 %v796_v44, %v92_v20  ;;  %v376_v46 = vld [vmem:[#allocation2 + $0x50] sm:$0xff]  ;;  %v374_v49 = vld [vmem:[#allocation2 + $0x40] sm:$0xff]  ;;  %v373_v44 = vld [vmem:[#allocation2 + $0x38] sm:$0xff] }
  0x93   :  { %v104_v55 = vand.u32 65535, %v100_v52  ;;  %v105_v56 = vshrl.u32 %v100_v52, 16  ;;  %388 = vmatpush.msra.mxu0 %v379_v40  ;;  %v372_v52 = vld [vmem:[#allocation2 + $0x30] sm:$0xff]  ;;  %v421_v16 = vld [vmem:[#allocation2 + $0xe8] sm:$0xff]  ;;  %v415_v20 = vld [vmem:[#allocation2 + $0xb8] sm:$0xff] }
  0x94   :  { %v129_v61 = vmul.u32 %v127_v58, %v102_v53  ;;  %v130_v62 = vmul.u32 %v126_v57, %v103_v54  ;;  %v128_v4 = vmul.u32 %v126_v57, %v102_v53  ;;  %v131_v8 = vmul.u32 %v127_v58, %v103_v54  ;;  %v370_v57 = vld [vmem:[#allocation2 + $0x20] sm:$0xff]  ;;  %v369_v58 = vld [vmem:[#allocation2 + $0x18] sm:$0xff]  ;;  %v418_v28 = vld [vmem:[#allocation2 + $0xd0] sm:$0xff] }
  0x95   :  { %v107_v59 = vmul.u32 %v105_v56, %v102_v53  ;;  %v108_v60 = vmul.u32 %v104_v55, %v103_v54  ;;  %v106_v63 = vmul.u32 %v104_v55, %v102_v53  ;;  %v109_v2 = vmul.u32 %v105_v56, %v103_v54  ;;  %389 = vmatpush.msra.mxu0 %v378_v42  ;;  %v371_v55 = vld [vmem:[#allocation2 + $0x28] sm:$0xff]  ;;  %v414_v37 = vld [vmem:[#allocation2 + $0xb0] sm:$0xff] }
  0x96   :  { %v132_v5 = vshll.u32 %v129_v61, 16  ;;  %v134_v10 = vshll.u32 %v130_v62, 16  ;;  %v133_v26 = vshrl.u32 %v129_v61, 16  ;;  %v135_v32 = vshrl.u32 %v130_v62, 16 }
  0x97   :  { %v110_v1 = vshll.u32 %v107_v59, 16  ;;  %v112_v6 = vshll.u32 %v108_v60, 16  ;;  %v111_v21 = vshrl.u32 %v107_v59, 16  ;;  %v113_v30 = vshrl.u32 %v108_v60, 16  ;;  %390 = vmatpush.msra.mxu0 %v377_v45  ;;  %v412_v45 = vld [vmem:[#allocation2 + $0xa0] sm:$0xff] }
  0x98   :  { %vm136_vm7 = vc.u32 %v128_v4, %v132_v5  ;;  %v138_v12 = vadd.s32 %v132_v5, %v128_v4  ;;  %v367_v5 = vld [vmem:[#allocation2 + $0x8] sm:$0xff] }
  0x99   :  { %vm114_vm6 = vc.u32 %v106_v63, %v110_v1  ;;  %v116_v7 = vadd.s32 %v110_v1, %v106_v63  ;;  %v137_v14 = vsel %vm136_vm7, 1, %v727_v0  ;;  %391 = vmatpush.msra.mxu0 %v376_v46  ;;  %v368_v63 = vld [vmem:[#allocation2 + $0x10] sm:$0xff]  ;;  %vm363_vm7 = vcmp.lt.s32.totalorder %v772_v3, 64  ;;  %v461_v3 = vld [vmem:[#allocation2 + $0x148] sm:$0xff] }
  0x9a   :  { %v115_v9 = vsel %vm114_vm6, 1, %v727_v0  ;;  %v139_v18 = vadd.s32 %v137_v14, %v131_v8  ;;  %vm140_vm9 = vc.u32 %v138_v12, %v134_v10  ;;  %v142_v35 = vadd.s32 %v138_v12, %v134_v10  ;;  %v366_v8 = vld [vmem:[#allocation2] sm:$0xff]  ;;  %v423_v10 = vld [vmem:[#allocation2 + $0xf8] sm:$0xff]  ;;  %v422_v12 = vld [vmem:[#allocation2 + $0xf0] sm:$0xff] }
  0x9b   :  { %v117_v13 = vadd.s32 %v115_v9, %v109_v2  ;;  %vm118_vm8 = vc.u32 %v116_v7, %v112_v6  ;;  %v141_v25 = vsel %vm140_vm9, 1, %v727_v0  ;;  %392 = vmatpush.msra.mxu0 %v375_v47  ;;  %429 = vmatpush.msra.mxu1 %v423_v10  ;;  %vm196_vm6 = vweird.f32 %v779_v11  ;;  %v459_v10 = vld [vmem:[#allocation2 + $0x138] sm:$0xff] }
  0x9c   :  { %v119_v17 = vsel %vm118_vm8, 1, %v727_v0  ;;  %v143_v27 = vadd.s32 %v141_v25, %v139_v18  ;;  %v420_v18 = vld [vmem:[#allocation2 + $0xe0] sm:$0xff] }
  0x9d   :  { %v121_v24 = vadd.s32 %v119_v17, %v117_v13  ;;  %393 = vmatpush.msra.mxu0 %v374_v49  ;;  %430 = vmatpush.msra.mxu1 %v422_v12  ;;  %v411_v49 = vld [vmem:[#allocation2 + $0x98] sm:$0xff]  ;;  %v458_v12 = vld [vmem:[#allocation2 + $0x130] sm:$0xff] }
  0x9e   :  { %v144_v33 = vadd.s32 %v143_v27, %v133_v26 }
  0x9f   :  { %v122_v31 = vadd.s32 %v121_v24, %v111_v21  ;;  %394 = vmatpush.msra.mxu0 %v373_v44  ;;  %431 = vmatpush.msra.mxu1 %v421_v16  ;;  %v419_v21 = vld [vmem:[#allocation2 + $0xd8] sm:$0xff]  ;;  %v454_v24 = vld [vmem:[#allocation2 + $0x110] sm:$0xff] }
  0xa0   :  { %v145_v23 = vadd.s32 %v144_v33, %v135_v32  ;;  %v416_v33 = vld [vmem:[#allocation2 + $0xc0] sm:$0xff]  ;;  %v455_v16 = vld [vmem:[#allocation2 + $0x118] sm:$0xff] }
  0xa1   :  { %v123_v34 = vadd.s32 %v122_v31, %v113_v30  ;;  %395 = vmatpush.msra.mxu0 %v372_v52  ;;  %432 = vmatpush.msra.mxu1 %v420_v18  ;;  %v417_v30 = vld [vmem:[#allocation2 + $0xc8] sm:$0xff] }
  0xa2   :  { %v149_v0 = vadd.s32 1, %v145_v23 }
  0xa3   :  { %vm148_vm10 = vc.u32 %v123_v34, %v142_v35  ;;  %396 = vmatpush.msra.mxu0 %v371_v55  ;;  %v147_v60 = vadd.s32 %v142_v35, %v123_v34  ;;  %433 = vmatpush.msra.mxu1 %v419_v21 }
  0xa4   :  { %v150_v39 = vsel %vm148_vm10, %v149_v0, %v145_v23 }
  0xa5   :  { %v151_v41 = vadd.s32 %v150_v39, %v146_v38  ;;  %397 = vmatpush.msra.mxu0 %v370_v57  ;;  %434 = vmatpush.msra.mxu1 %v418_v28  ;;  %v509_v28 = vld [vmem:[#allocation2 + $0x1f0] sm:$0xff] }
  0xa7   :  { %v152_v43 = vadd.s32 536870912, %v151_v41  ;;  %398 = vmatpush.msra.mxu0 %v369_v58  ;;  %435 = vmatpush.msra.mxu1 %v417_v30  ;;  %v364_v58 = vld [vmem:[%s883_s1] sm:$0xff] }
  0xa8   :  { %v507_v30 = vld [vmem:[#allocation2 + $0x1e0] sm:$0xff] }
  0xa9   :  { %v834_v22 = vshrl.u32 %v152_v43, 30  ;;  %399 = vmatpush.msra.mxu0 %v368_v63  ;;  %436 = vmatpush.msra.mxu1 %v416_v33  ;;  %v410_v63 = vld [vmem:[#allocation2 + $0x90] sm:$0xff]  ;;  %v503_v33 = vld [vmem:[#allocation2 + $0x1c0] sm:$0xff] }
  0xab   :  { %v154_v48 = vshll.u32 %v834_v22, 30  ;;  %400 = vmatpush.msra.mxu0 %v367_v5  ;;  %v177_v27 = vsub.s32 4, %v834_v22  ;;  %437 = vmatpush.msra.mxu1 %v415_v20  ;;  %v465_v5 = vld [vmem:[#allocation2 + $0x168] sm:$0xff] }
  0xac   :  { %v500_v20 = vld [vmem:[#allocation2 + $0x1a8] sm:$0xff] }
  0xad   :  { %v155_v50 = vsub.s32 %v151_v41, %v154_v48  ;;  %401 = vmatpush.msra.mxu0 %v366_v8  ;;  %v178_v15 = vsel %vm55_vm13, %v177_v27, %v834_v22  ;;  %v413_v41 = vld [vmem:[#allocation2 + $0xa8] sm:$0xff]  ;;  %438 = vmatpush.msra.mxu1 %v414_v37  ;;  %v462_v8 = vld [vmem:[#allocation2 + $0x150] sm:$0xff]  ;;  %v510_v27 = vld [vmem:[#allocation2 + $0x1f8] sm:$0xff] }
  0xae   :  { %v180_v23 = vsel %vm840_vm14, 0, %v178_v15  ;;  %516 = vmatpush.msra.mxu3 %v510_v27  ;;  %v504_v15 = vld [vmem:[#allocation2 + $0x1c8] sm:$0xff] }
  0xaf   :  { %vm156_vm11 = vcmp.lt.s32.totalorder %v155_v50, 0  ;;  %v157_v51 = vsub.s32 0, %v155_v50  ;;  %v351_v40 = vadd.s32 3, %v180_v23  ;;  %v197_v47 = vand.u32 3, %v180_v23  ;;  %439 = vmatpush.msra.mxu1 %v413_v41  ;;  %v499_v23 = vld [vmem:[#allocation2 + $0x1a0] sm:$0xff]  ;;  %v497_v41 = vld [vmem:[#allocation2 + $0x190] sm:$0xff] }
  0xb0   :  { %517 = vmatpush.msra.mxu3 %v509_v28  ;;  %v669_v28 = vld [vmem:[%s886_s4 + $0x5] ss:$0 sm:$0xff] }
  0xb1   :  { %v158_v53 = vsel %vm156_vm11, %v157_v51, %v155_v50  ;;  %v352_v48 = vand.u32 3, %v351_v40  ;;  %440 = vmatpush.msra.mxu1 %v412_v45  ;;  %vm198_vm15 = vcmp.lt.s32.totalorder %v197_v47, 2  ;;  %vm199_vm1 = vcmp.eq.s32.totalorder %v197_v47, 0  ;;  %v553_v45 = vld [vmem:[#allocation2 + $0x278] sm:$0xff] }
  0xb2   :  { %v159_v54 = vclz %v158_v53  ;;  %vm202_vm2 = vcmp.eq.s32.totalorder %v197_v47, 2  ;;  %559 = vmatpush.msrb.mxu0 %v553_v45  ;;  %v550_v47 = vld [vmem:[#allocation2 + $0x260] sm:$0xff] }
  0xb3   :  { %441 = vmatpush.msra.mxu1 %v411_v49  ;;  %vm353_vm3 = vcmp.lt.s32.totalorder %v352_v48, 2  ;;  %vm354_vm4 = vcmp.eq.s32.totalorder %v352_v48, 0  ;;  %vm357_vm5 = vcmp.eq.s32.totalorder %v352_v48, 2  ;;  %v549_v48 = vld [vmem:[#allocation2 + $0x258] sm:$0xff]  ;;  %v548_v49 = vld [vmem:[#allocation2 + $0x250] sm:$0xff] }
  0xb4   :  { %v642_v56 = vadd.s32 4294967294, %v159_v54 }
  0xb5   :  { %442 = vmatpush.msra.mxu1 %v410_v63  ;;  %v596_v63 = vld [vmem:[#allocation2 + $0x2f8] sm:$0xff] }
  0xb6   :  { %vm643_vm12 = vcmp.lt.s32.totalorder %v642_v56, 0 }
  0xb7   :  { %v162_v59 = vsel %vm643_vm12, 0, %v642_v56 }
  0xb8   :  { %v163_v61 = vsub.s32 32, %v162_v59  ;;  %v167_v62 = vsub.s32 4294967266, %v162_v59  ;;  %v164_v1 = vshll.u32 %v155_v50, %v162_v59 }
  0xba   :  { %v165_v2 = vshrl.u32 %v147_v60, %v163_v61  ;;  %v168_v4 = vadd.s32 127, %v167_v62 }
  0xbc   :  { %v166_v6 = vor.u32 %v165_v2, %v164_v1  ;;  %v169_v7 = vshll.u32 %v168_v4, 23  ;;  %v409_v1 = vld [vmem:[#allocation2 + $0x88] sm:$0xff]  ;;  %v467_v2 = vld [vmem:[#allocation2 + $0x178] sm:$0xff]  ;;  %v466_v4 = vld [vmem:[#allocation2 + $0x170] sm:$0xff] }
  0xbd   :  { %443 = vmatpush.msra.mxu1 %v409_v1  ;;  %473 = vmatpush.msra.mxu2 %v467_v2  ;;  %v595_v1 = vld [vmem:[#allocation2 + $0x2f0] sm:$0xff]  ;;  %v593_v2 = vld [vmem:[#allocation2 + $0x2e0] sm:$0xff] }
  0xbe   :  { %v170_v9 = vor.u32 4788187, %v169_v7  ;;  %v173_v14 = vcvt.s32.f32 %v166_v6  ;;  %v464_v6 = vld [vmem:[#allocation2 + $0x160] sm:$0xff]  ;;  %v463_v7 = vld [vmem:[#allocation2 + $0x158] sm:$0xff] }
  0xbf   :  { %474 = vmatpush.msra.mxu2 %v466_v4  ;;  %v592_v4 = vld [vmem:[#allocation2 + $0x2d8] sm:$0xff] }
  0xc0   :  { %v171_v13 = vand.u32 2147483647, %v170_v9  ;;  %v460_v9 = vld [vmem:[#allocation2 + $0x140] sm:$0xff] }
  0xc1   :  { %475 = vmatpush.msra.mxu2 %v465_v5  ;;  %v591_v5 = vld [vmem:[#allocation2 + $0x2d0] sm:$0xff] }
  0xc2   :  { %v174_v17 = vmul.f32 %v173_v14, %v171_v13  ;;  %v457_v13 = vld [vmem:[#allocation2 + $0x128] sm:$0xff]  ;;  %v456_v14 = vld [vmem:[#allocation2 + $0x120] sm:$0xff] }
  0xc3   :  { %476 = vmatpush.msra.mxu2 %v464_v6  ;;  %v590_v6 = vld [vmem:[#allocation2 + $0x2c8] sm:$0xff] }
  0xc4   :  { %v175_v19 = vxor.u32 2147483648, %v174_v17 }
  0xc5   :  { %477 = vmatpush.msra.mxu2 %v463_v7  ;;  %v589_v7 = vld [vmem:[#allocation2 + $0x2c0] sm:$0xff] }
  0xc6   :  { %v176_v25 = vsel %vm55_vm13, %v175_v19, %v174_v17  ;;  %v664_v17 = vld [vmem:[%s886_s4] ss:$0 sm:$0xff] }
  0xc7   :  { %v179_v26 = vsel %vm840_vm14, %v779_v11, %v176_v25  ;;  %v408_v11 = vld [vmem:[#allocation2 + $0x80] sm:$0xff]  ;;  %478 = vmatpush.msra.mxu2 %v462_v8  ;;  %v453_v25 = vld [vmem:[#allocation2 + $0x108] sm:$0xff]  ;;  %v588_v8 = vld [vmem:[#allocation2 + $0x2b8] sm:$0xff] }
  0xc8   :  { %v181_v29 = vmul.f32 %v179_v26, %v179_v26  ;;  %444 = vmatpush.msra.mxu1 %v408_v11  ;;  %v594_v11 = vld [vmem:[#allocation2 + $0x2e8] sm:$0xff] }
  0xc9   :  { %479 = vmatpush.msra.mxu2 %v461_v3  ;;  %v587_v3 = vld [vmem:[#allocation2 + $0x2b0] sm:$0xff] }
  0xca   :  { %v182_v31 = vmul.f32 -0.001358992, %v181_v29  ;;  %v189_v32 = vmul.f32 -0.00019511016, %v181_v29  ;;  %602 = vmatpush.msrb.mxu1 %v596_v63 }
  0xcb   :  { %480 = vmatpush.msra.mxu2 %v460_v9  ;;  %v586_v9 = vld [vmem:[#allocation2 + $0x2a8] sm:$0xff] }
  0xcc   :  { %v183_v34 = vadd.f32 0.041655596, %v182_v31  ;;  %v190_v35 = vadd.f32 0.008332121, %v189_v32  ;;  %v506_v31 = vld [vmem:[#allocation2 + $0x1d8] sm:$0xff]  ;;  %v505_v32 = vld [vmem:[#allocation2 + $0x1d0] sm:$0xff]  ;;  %603 = vmatpush.msrb.mxu1 %v595_v1 }
  0xcd   :  { %481 = vmatpush.msra.mxu2 %v459_v10  ;;  %v585_v10 = vld [vmem:[#allocation2 + $0x2a0] sm:$0xff] }
  0xce   :  { %v184_v36 = vmul.f32 %v183_v34, %v181_v29  ;;  %v191_v0 = vmul.f32 %v190_v35, %v181_v29  ;;  %v502_v34 = vld [vmem:[#allocation2 + $0x1b8] sm:$0xff]  ;;  %v501_v35 = vld [vmem:[#allocation2 + $0x1b0] sm:$0xff]  ;;  %604 = vmatpush.msrb.mxu1 %v594_v11 }
  0xcf   :  { %482 = vmatpush.msra.mxu2 %v458_v12  ;;  %v584_v12 = vld [vmem:[#allocation2 + $0x298] sm:$0xff] }
  0xd0   :  { %v185_v38 = vadd.f32 -0.4999988, %v184_v36  ;;  %v192_v39 = vadd.f32 -0.16666654, %v191_v0  ;;  %v498_v36 = vld [vmem:[#allocation2 + $0x198] sm:$0xff]  ;;  %605 = vmatpush.msrb.mxu1 %v593_v2 }
  0xd1   :  { %483 = vmatpush.msra.mxu2 %v457_v13  ;;  %v665_v0 = vld [vmem:[%s886_s4 + $0x1] ss:$0 sm:$0xff]  ;;  %v667_v13 = vld [vmem:[%s886_s4 + $0x3] ss:$0 sm:$0xff] }
  0xd2   :  { %v186_v42 = vmul.f32 %v185_v38, %v181_v29  ;;  %v193_v43 = vmul.f32 %v192_v39, %v181_v29  ;;  %v508_v29 = vld [vmem:[#allocation2 + $0x1e8] sm:$0xff]  ;;  %v449_v38 = vld [vmem:[%s884_s2] sm:$0xff]  ;;  %606 = vmatpush.msrb.mxu1 %v592_v4 }
  0xd3   :  { %484 = vmatpush.msra.mxu2 %v456_v14  ;;  %518 = vmatpush.msra.mxu3 %v508_v29 }
  0xd4   :  { %v187_v46 = vadd.f32 1.0, %v186_v42  ;;  %v194_v22 = vadd.f32 1.0, %v193_v43  ;;  %v496_v42 = vld [vmem:[#allocation2 + $0x188] sm:$0xff]  ;;  %v495_v43 = vld [vmem:[#allocation2 + $0x180] sm:$0xff]  ;;  %607 = vmatpush.msrb.mxu1 %v591_v5 }
  0xd5   :  { %485 = vmatpush.msra.mxu2 %v455_v16  ;;  %519 = vmatpush.msra.mxu3 %v507_v30 }
  0xd6   :  { %v195_v50 = vmul.f32 %v194_v22, %v179_v26  ;;  %v203_v44 = vxor.u32 2147483648, %v187_v46  ;;  %v452_v26 = vld [vmem:[#allocation2 + $0x100] sm:$0xff]  ;;  %v551_v22 = vld [vmem:[#allocation2 + $0x268] sm:$0xff]  ;;  %608 = vmatpush.msrb.mxu1 %v590_v6 }
  0xd7   :  { %486 = vmatpush.msra.mxu2 %v454_v24  ;;  %520 = vmatpush.msra.mxu3 %v506_v31  ;;  %v668_v24 = vld [vmem:[%s886_s4 + $0x4] ss:$0 sm:$0xff] }
  0xd8   :  { %v200_v51 = vxor.u32 2147483648, %v195_v50  ;;  %v204_v53 = vsel %vm202_vm2, %v203_v44, %v195_v50  ;;  %v359_v55 = vsel %vm357_vm5, %v203_v44, %v195_v50  ;;  %v547_v50 = vld [vmem:[#allocation2 + $0x248] sm:$0xff]  ;;  %v546_v44 = vld [vmem:[#allocation2 + $0x240] sm:$0xff]  ;;  %609 = vmatpush.msrb.mxu1 %v589_v7 }
  0xd9   :  { %487 = vmatpush.msra.mxu2 %v453_v25  ;;  %521 = vmatpush.msra.mxu3 %v505_v32 }
  0xda   :  { %v201_v52 = vsel %vm199_vm1, %v187_v46, %v200_v51  ;;  %v356_v54 = vsel %vm354_vm4, %v187_v46, %v200_v51  ;;  %v552_v46 = vld [vmem:[#allocation2 + $0x270] sm:$0xff]  ;;  %v545_v51 = vld [vmem:[#allocation2 + $0x238] sm:$0xff]  ;;  %610 = vmatpush.msrb.mxu1 %v588_v8 }
  0xdb   :  { %v205_v56 = vsel %vm198_vm15, %v201_v52, %v204_v53  ;;  %v360_v57 = vsel %vm353_vm3, %v356_v54, %v359_v55  ;;  %488 = vmatpush.msra.mxu2 %v452_v26  ;;  %522 = vmatpush.msra.mxu3 %v504_v15  ;;  %v544_v52 = vld [vmem:[#allocation2 + $0x230] sm:$0xff]  ;;  %v543_v53 = vld [vmem:[#allocation2 + $0x228] sm:$0xff]  ;;  %v542_v54 = vld [vmem:[#allocation2 + $0x220] sm:$0xff] }
  0xdc   :  { %v206_v59 = vsel %vm196_vm6, nan, %v205_v56  ;;  %v361_v60 = vsel %vm196_vm6, nan, %v360_v57  ;;  %560 = vmatpush.msrb.mxu0 %v552_v46  ;;  %v541_v55 = vld [vmem:[#allocation2 + $0x218] sm:$0xff]  ;;  %v666_v56 = vld [vmem:[%s886_s4 + $0x2] ss:$0 sm:$0xff]  ;;  %611 = vmatpush.msrb.mxu1 %v587_v3 }
  0xdd   :  { %v362_v61 = vsel %vm39_vm0, %v206_v59, %v361_v60  ;;  %523 = vmatpush.msra.mxu3 %v503_v33  ;;  %v540_v60 = vld [vmem:[#allocation2 + $0x210] sm:$0xff] }
  0xde   :  { %v365_v62 = vsel %vm363_vm7, %v362_v61, %v364_v58  ;;  %561 = vmatpush.msrb.mxu0 %v551_v22  ;;  %v539_v61 = vld [vmem:[#allocation2 + $0x208] sm:$0xff]  ;;  %612 = vmatpush.msrb.mxu1 %v586_v9 }
  0xdf   :  { %402 = vmatmul.f32.vlgmr.msra.gmra.mxu0 %v365_v62  ;;  %524 = vmatpush.msra.mxu3 %v502_v34  ;;  %v538_v62 = vld [vmem:[#allocation2 + $0x200] sm:$0xff] }
  0xe0   :  { %562 = vmatpush.msrb.mxu0 %v550_v47  ;;  %613 = vmatpush.msrb.mxu1 %v585_v10 }
  0xe1   :  { %525 = vmatpush.msra.mxu3 %v501_v35 }
  0xe2   :  { %563 = vmatpush.msrb.mxu0 %v549_v48  ;;  %614 = vmatpush.msrb.mxu1 %v584_v12 }
  0xe3   :  { %526 = vmatpush.msra.mxu3 %v500_v20 }
  0xe4   :  { %564 = vmatpush.msrb.mxu0 %v548_v49 }
  0xe5   :  { %527 = vmatpush.msra.mxu3 %v499_v23 }
  0xe6   :  { %565 = vmatpush.msrb.mxu0 %v547_v50 }
  0xe7   :  { %528 = vmatpush.msra.mxu3 %v498_v36 }
  0xe8   :  { %566 = vmatpush.msrb.mxu0 %v546_v44 }
  0xe9   :  { %529 = vmatpush.msra.mxu3 %v497_v41 }
  0xea   :  { %567 = vmatpush.msrb.mxu0 %v545_v51 }
  0xeb   :  { %530 = vmatpush.msra.mxu3 %v496_v42 }
  0xec   :  { %568 = vmatpush.msrb.mxu0 %v544_v52 }
  0xed   :  { %531 = vmatpush.msra.mxu3 %v495_v43 }
  0xee   :  { %569 = vmatpush.msrb.mxu0 %v543_v53 }
  0xf0   :  { %570 = vmatpush.msrb.mxu0 %v542_v54 }
  0xf2   :  { %571 = vmatpush.msrb.mxu0 %v541_v55 }
  0xf4   :  { %572 = vmatpush.msrb.mxu0 %v540_v60 }
  0xf6   :  { %573 = vmatpush.msrb.mxu0 %v539_v61 }
  0xf8   :  { %574 = vmatpush.msrb.mxu0 %v538_v62 }
 0x15c   :  { %v403_v18 = vpop.f32.mrf.mxu0 }
 0x15d   :  { %v404_v19 = vadd.f32 %v664_v17, %v403_v18  ;;  %v583_v18 = vld [vmem:[#allocation2 + $0x290] sm:$0xff] }
 0x15e   :  { %615 = vmatpush.msrb.mxu1 %v583_v18 }
 0x15f   :  { %v406_v21 = vmax.f32 %v404_v19, 0.0  ;;  %v582_v19 = vld [vmem:[#allocation2 + $0x288] sm:$0xff] }
 0x160   :  { %616 = vmatpush.msrb.mxu1 %v582_v19 }
 0x161   :  { %445 = vmatmul.f32.vlgmr.msra.gmra.mxu1 %v406_v21  ;;  %v581_v21 = vld [vmem:[#allocation2 + $0x280] sm:$0xff] }
 0x162   :  { %617 = vmatpush.msrb.mxu1 %v581_v21 }
 0x1de   :  { %v446_v37 = vpop.f32.mrf.mxu1 }
 0x1df   :  { %v447_v39 = vadd.f32 %v665_v0, %v446_v37 }
 0x1e1   :  { %v450_v40 = vadd.f32 %v449_v38, %v447_v39 }
 0x1e3   :  { %489 = vmatmul.f32.vlgmr.msra.gmra.mxu2 %v450_v40 }
 0x266   :  { %v490_v57 = vpop.f32.mrf.mxu2 }
 0x267   :  { %v491_v58 = vadd.f32 %v666_v56, %v490_v57 }
 0x269   :  { %v493_v59 = vmax.f32 %v491_v58, 0.0 }
 0x26b   :  { %532 = vmatmul.f32.vlgmr.msra.gmra.mxu3 %v493_v59 }
 0x2ee   :  { %v533_v14 = vpop.f32.mrf.mxu3 }
 0x2ef   :  { %v534_v16 = vadd.f32 %v667_v13, %v533_v14 }
 0x2f1   :  { %v536_v17 = vmax.f32 %v534_v16, 0.0 }
 0x2f3   :  { %575 = vmatmul.f32.vlgmr.msrb.gmra.mxu0 %v536_v17 }
 0x370   :  { %v576_v25 = vpop.f32.mrf.mxu0 }
 0x371   :  { %v577_v26 = vadd.f32 %v668_v24, %v576_v25 }
 0x373   :  { %v579_v27 = vmax.f32 %v577_v26, 0.0 }
 0x375   :  { %618 = vmatmul.f32.vlgmr.msrb.gmra.mxu1 %v579_v27 }
 0x3f2   :  { %v619_v29 = vpop.f32.mrf.mxu1 }
 0x3f3   :  { %v620_v30 = vadd.f32 %v669_v28, %v619_v29 }
 0x3f5   :  { %622 = vst [vmem:[#allocation5] sm:$0xff] %v620_v30 }
 0x3f6   :  { %633 = dma.vmem_to_hbm [thread:$0]  %s629_s15, 128, %s631_s18, [#allocation4]  }
 0x3f7   :  { %722 = dma.done.wait [#allocation4], 128  }
 0x3f8   :  { %723 = vsyncadd [#allocation4], 4294967168 }
 0x3f9   :  { %638 = vsyncpa [#allocation3], 1 }
 0x3fa   :  { %639 = vsyncpa [#allocation4], 1 }

</bundles_post_ra>
